<compile_context>
chip_gen: v7x
topology: tpu7x:2x2x1
jax: 0.10.0
libtpu: 0.0.40
codegen_flags: <defaults>
</compile_context>

<pallas_src>
import functools

import jax
import jax.numpy as jnp
from jax.experimental import pallas as pl
from jax.experimental.pallas import tpu as pltpu


def _final_layer_kernel(c_ref, x_ref, w_ada_ref, b_ada_ref, w_lin_ref, b_lin_ref,
                        o_ref, *, eps):
    b = pl.program_id(0)
    H = x_ref.shape[-1]

    # ---- adaLN modulation for this batch row: SiLU(c[b]) @ W_ada + b_ada ----
    c_row = c_ref[pl.ds(b, 1), :].astype(jnp.float32)                # (1, H)
    c_act = c_row * jax.nn.sigmoid(c_row)                            # SiLU in f32
    ada = jnp.dot(c_act.astype(w_ada_ref.dtype), w_ada_ref[...],
                  preferred_element_type=jnp.float32)
    ada = ada + b_ada_ref[...]                                       # f32 bias add
    shift = ada[:, :H]                                               # (1, H)
    scale = ada[:, H:]                                               # (1, H)

    # ---- LayerNorm (no affine) in f32, then modulate ----
    x = x_ref[...].astype(jnp.float32)                               # (TT, H)
    mu = jnp.mean(x, axis=-1, keepdims=True)
    xc = x - mu
    var = jnp.mean(xc * xc, axis=-1, keepdims=True)
    xn = xc * jax.lax.rsqrt(var + eps)
    xm = xn * (scale + 1.0) + shift                                  # broadcast over tokens

    # ---- final Linear(H -> Dout), bf16 operands, f32 accumulate, f32 bias ----
    out = jnp.dot(xm.astype(w_lin_ref.dtype), w_lin_ref[...],
                  preferred_element_type=jnp.float32)
    out = out + b_lin_ref[...]
    o_ref[...] = out.astype(o_ref.dtype)


def final_layer_pallas(x, c, w_ada, b_ada, w_lin, b_lin, *,
                       eps=1e-6, token_tile=128, out_dtype=None):
    """FinalLayer forward.

    x:     (B, T, H)   tokens
    c:     (B, H)      conditioning
    w_ada: (H, 2H)     adaLN Linear weight, stored (in, out)
    b_ada: (2H,)
    w_lin: (H, Dout)   final Linear weight, stored (in, out)
    b_lin: (Dout,)
    """
    B, T, H = x.shape
    Dout = w_lin.shape[1]
    out_dtype = x.dtype if out_dtype is None else out_dtype

    TT = min(token_tile, T)
    if TT % 8 != 0:          # keep sublane-aligned tile, else fall back to full extent
        TT = T
    grid = (B, pl.cdiv(T, TT))

    # bf16 weights (halve weight DMA; MXU-native). Biases stay f32.
    w_ada_bf = w_ada.astype(jnp.bfloat16)
    w_lin_bf = w_lin.astype(jnp.bfloat16)
    b_ada_2d = b_ada.reshape(1, 2 * H).astype(jnp.float32)
    b_lin_2d = b_lin.reshape(1, Dout).astype(jnp.float32)
    c_f32 = c.astype(jnp.float32)

    kernel = functools.partial(_final_layer_kernel, eps=eps)

    return pl.pallas_call(
        kernel,
        out_shape=jax.ShapeDtypeStruct((B, T, Dout), out_dtype),
        grid_spec=pltpu.PrefetchScalarGridSpec(
            num_scalar_prefetch=0,
            grid=grid,
            in_specs=[
                pl.BlockSpec((B, H), lambda b, t: (0, 0)),             # c (resident)
                pl.BlockSpec((None, TT, H), lambda b, t: (b, t, 0)),   # x tile
                pl.BlockSpec((H, 2 * H), lambda b, t: (0, 0)),         # w_ada (const idx)
                pl.BlockSpec((1, 2 * H), lambda b, t: (0, 0)),         # b_ada
                pl.BlockSpec((H, Dout), lambda b, t: (0, 0)),          # w_lin (const idx)
                pl.BlockSpec((1, Dout), lambda b, t: (0, 0)),          # b_lin
            ],
            out_specs=pl.BlockSpec((None, TT, Dout), lambda b, t: (b, t, 0)),
        ),
        compiler_params=pltpu.CompilerParams(
            dimension_semantics=("parallel", "parallel"),
        ),
    )(c_f32, x, w_ada_bf, b_ada_2d, w_lin_bf, b_lin_2d)


def _reference(x, c, w_ada, b_ada, w_lin, b_lin, eps=1e-6):
    """Pure-JAX f32 reference mirroring the PyTorch FinalLayer."""
    H = x.shape[-1]
    c_act = c * jax.nn.sigmoid(c)                      # SiLU
    ada = c_act @ w_ada + b_ada                        # (B, 2H)
    shift, scale = ada[:, :H], ada[:, H:]
    mu = jnp.mean(x, axis=-1, keepdims=True)
    var = jnp.mean((x - mu) ** 2, axis=-1, keepdims=True)
    xn = (x - mu) / jnp.sqrt(var + eps)
    xm = xn * (scale[:, None, :] + 1.0) + shift[:, None, :]
    return xm @ w_lin + b_lin


if __name__ == "__main__":
    key = jax.random.PRNGKey(0)
    B, T, H = 2, 64, 128
    patch_size, out_channels = 4, 8                 # use_video=False -> Dout = p*p*C = 128
    Dout = patch_size * patch_size * out_channels

    k_x, k_c, k_wa, k_ba, k_wl, k_bl = jax.random.split(key, 6)
    x = jax.random.normal(k_x, (B, T, H), dtype=jnp.float32)
    c = jax.random.normal(k_c, (B, H), dtype=jnp.float32)
    w_ada = jax.random.normal(k_wa, (H, 2 * H), dtype=jnp.float32) * 0.02
    b_ada = jax.random.normal(k_ba, (2 * H,), dtype=jnp.float32) * 0.02
    w_lin = jax.random.normal(k_wl, (H, Dout), dtype=jnp.float32) * 0.02
    b_lin = jax.random.normal(k_bl, (Dout,), dtype=jnp.float32) * 0.02

    out = final_layer_pallas(x, c, w_ada, b_ada, w_lin, b_lin, token_tile=32)
    out = jax.block_until_ready(out)

    ref = _reference(x, c, w_ada, b_ada, w_lin, b_lin)
    assert out.shape == (B, T, Dout)
    # bf16 weights/activations on the MXU vs f32 reference -> loose-ish tolerance.
    max_diff = jnp.max(jnp.abs(out - ref))
    assert jnp.allclose(out, ref, atol=2e-2, rtol=2e-2), f"mismatch vs reference: {max_diff}"

    print("KERNEL_OK")
</pallas_src>

<mosaic_0001>
module attributes {stable_mosaic.version = 11 : i64} {
  func.func @_final_layer_kernel(%arg0: i32, %arg1: i32, %arg2: memref<2x128xf32, #tpu.memory_space<vmem>>, %arg3: memref<1x32x128xf32, #tpu.memory_space<vmem>>, %arg4: memref<128x256xbf16, #tpu.memory_space<vmem>>, %arg5: memref<1x256xf32, #tpu.memory_space<vmem>>, %arg6: memref<128x128xbf16, #tpu.memory_space<vmem>>, %arg7: memref<1x128xf32, #tpu.memory_space<vmem>>, %arg8: memref<1x32x128xf32, #tpu.memory_space<vmem>>) attributes {dimension_semantics = [#tpu.dimension_semantics<parallel>, #tpu.dimension_semantics<parallel>], iteration_bounds = array<i64: 2, 2>, scalar_prefetch = 0 : i64, scratch_operands = 0 : i64, tpu.core_type = #tpu.core_type<tc>, window_params = [{pipeline_mode = #tpu.pipeline_mode<synchronous>, transform_indices = @transform_0, window_bounds = array<i64: 2, 128>}, {transform_indices = @transform_1, window_bounds = array<i64: 1, 32, 128>}, {pipeline_mode = #tpu.pipeline_mode<synchronous>, transform_indices = @transform_2, window_bounds = array<i64: 128, 256>}, {pipeline_mode = #tpu.pipeline_mode<synchronous>, transform_indices = @transform_3, window_bounds = array<i64: 1, 256>}, {pipeline_mode = #tpu.pipeline_mode<synchronous>, transform_indices = @transform_4, window_bounds = array<i64: 128, 128>}, {pipeline_mode = #tpu.pipeline_mode<synchronous>, transform_indices = @transform_5, window_bounds = array<i64: 1, 128>}, {transform_indices = @transform_6, window_bounds = array<i64: 1, 32, 128>}]} {
    %0 = arith.index_cast %arg0 : i32 to index
    %c0 = arith.constant 0 : index
    %1 = vector.load %arg2[%0, %c0] : memref<2x128xf32, #tpu.memory_space<vmem>>, vector<1x128xf32>
    %2 = arith.negf %1 : vector<1x128xf32>
    %3 = math.exp %2 : vector<1x128xf32>
    %cst = arith.constant 1.000000e+00 : f32
    %4 = vector.broadcast %cst : f32 to vector<1x128xf32>
    %5 = arith.addf %4, %3 : vector<1x128xf32>
    %6 = arith.divf %4, %5 : vector<1x128xf32>
    %7 = arith.mulf %1, %6 : vector<1x128xf32>
    %8 = arith.truncf %7 : vector<1x128xf32> to vector<1x128xbf16>
    %c0_0 = arith.constant 0 : index
    %c0_1 = arith.constant 0 : index
    %9 = vector.load %arg4[%c0_0, %c0_1] : memref<128x256xbf16, #tpu.memory_space<vmem>>, vector<128x256xbf16>
    %cst_2 = arith.constant dense<0.000000e+00> : vector<1x256xf32>
    %10 = tpu.matmul %8, %9, %cst_2 {dimension_numbers = #tpu.dot_dimension_numbers<[1], [0], [0], [1], [0, 0, 1, 1], [], []>} : vector<1x128xbf16>, vector<128x256xbf16>, vector<1x256xf32> -> vector<1x256xf32>
    %c0_3 = arith.constant 0 : index
    %c0_4 = arith.constant 0 : index
    %11 = vector.load %arg5[%c0_3, %c0_4] : memref<1x256xf32, #tpu.memory_space<vmem>>, vector<1x256xf32>
    %12 = arith.addf %10, %11 : vector<1x256xf32>
    %13 = vector.extract_strided_slice %12 {offsets = [0, 0], sizes = [1, 128], strides = [1, 1]} : vector<1x256xf32> to vector<1x128xf32>
    %14 = vector.extract_strided_slice %12 {offsets = [0, 128], sizes = [1, 128], strides = [1, 1]} : vector<1x256xf32> to vector<1x128xf32>
    %c0_5 = arith.constant 0 : index
    %c0_6 = arith.constant 0 : index
    %c0_7 = arith.constant 0 : index
    %15 = vector.load %arg3[%c0_5, %c0_6, %c0_7] : memref<1x32x128xf32, #tpu.memory_space<vmem>>, vector<1x32x128xf32>
    %16 = vector.shape_cast %15 : vector<1x32x128xf32> to vector<32x128xf32>
    %cst_8 = arith.constant dense<0.000000e+00> : vector<32xf32>
    %17 = vector.multi_reduction <add>, %16, %cst_8 [1] : vector<32x128xf32> to vector<32xf32>
    %18 = vector.shape_cast %17 : vector<32xf32> to vector<32x1xf32>
    %cst_9 = arith.constant 1.280000e+02 : f32
    %19 = vector.broadcast %cst_9 : f32 to vector<32x1xf32>
    %20 = arith.divf %18, %19 : vector<32x1xf32>
    %21 = vector.broadcast %20 : vector<32x1xf32> to vector<32x128xf32>
    %22 = arith.subf %16, %21 : vector<32x128xf32>
    %23 = arith.mulf %22, %22 : vector<32x128xf32>
    %cst_10 = arith.constant dense<0.000000e+00> : vector<32xf32>
    %24 = vector.multi_reduction <add>, %23, %cst_10 [1] : vector<32x128xf32> to vector<32xf32>
    %25 = vector.shape_cast %24 : vector<32xf32> to vector<32x1xf32>
    %cst_11 = arith.constant 1.280000e+02 : f32
    %26 = vector.broadcast %cst_11 : f32 to vector<32x1xf32>
    %27 = arith.divf %25, %26 : vector<32x1xf32>
    %cst_12 = arith.constant 9.99999997E-7 : f32
    %28 = vector.broadcast %cst_12 : f32 to vector<32x1xf32>
    %29 = arith.addf %27, %28 : vector<32x1xf32>
    %30 = math.rsqrt %29 : vector<32x1xf32>
    %31 = vector.broadcast %30 : vector<32x1xf32> to vector<32x128xf32>
    %32 = arith.mulf %22, %31 : vector<32x128xf32>
    %cst_13 = arith.constant 1.000000e+00 : f32
    %33 = vector.broadcast %cst_13 : f32 to vector<1x128xf32>
    %34 = arith.addf %14, %33 : vector<1x128xf32>
    %35 = vector.broadcast %34 : vector<1x128xf32> to vector<32x128xf32>
    %36 = arith.mulf %32, %35 : vector<32x128xf32>
    %37 = vector.broadcast %13 : vector<1x128xf32> to vector<32x128xf32>
    %38 = arith.addf %36, %37 : vector<32x128xf32>
    %39 = arith.truncf %38 : vector<32x128xf32> to vector<32x128xbf16>
    %c0_14 = arith.constant 0 : index
    %c0_15 = arith.constant 0 : index
    %40 = vector.load %arg6[%c0_14, %c0_15] : memref<128x128xbf16, #tpu.memory_space<vmem>>, vector<128x128xbf16>
    %cst_16 = arith.constant dense<0.000000e+00> : vector<32x128xf32>
    %41 = tpu.matmul %39, %40, %cst_16 {dimension_numbers = #tpu.dot_dimension_numbers<[1], [0], [0], [1], [0, 0, 1, 1], [], []>} : vector<32x128xbf16>, vector<128x128xbf16>, vector<32x128xf32> -> vector<32x128xf32>
    %c0_17 = arith.constant 0 : index
    %c0_18 = arith.constant 0 : index
    %42 = vector.load %arg7[%c0_17, %c0_18] : memref<1x128xf32, #tpu.memory_space<vmem>>, vector<1x128xf32>
    %43 = vector.broadcast %42 : vector<1x128xf32> to vector<32x128xf32>
    %44 = arith.addf %41, %43 : vector<32x128xf32>
    %c0_19 = arith.constant 0 : index
    %c0_20 = arith.constant 0 : index
    %c0_21 = arith.constant 0 : index
    %45 = vector.load %arg8[%c0_19, %c0_20, %c0_21] : memref<1x32x128xf32, #tpu.memory_space<vmem>>, vector<1x32x128xf32>
    %46 = vector.shape_cast %45 : vector<1x32x128xf32> to vector<32x128xf32>
    %47 = vector.shape_cast %44 : vector<32x128xf32> to vector<1x32x128xf32>
    tpu.vector_store %arg8[%c0_19, %c0_20, %c0_21], %47 {strides = array<i32>} : memref<1x32x128xf32, #tpu.memory_space<vmem>>, vector<1x32x128xf32>,
    return
  }
  func.func @transform_0(%arg0: i32, %arg1: i32) -> (i32, i32) {
    %c0_i32 = arith.constant 0 : i32
    %c0_i32_0 = arith.constant 0 : i32
    %c0_i32_1 = arith.constant 0 : i32
    return %c0_i32, %c0_i32_0 : i32, i32
  }
  func.func @transform_1(%arg0: i32, %arg1: i32) -> (i32, i32, i32) {
    %c0_i32 = arith.constant 0 : i32
    %c0_i32_0 = arith.constant 0 : i32
    return %arg0, %arg1, %c0_i32 : i32, i32, i32
  }
  func.func @transform_2(%arg0: i32, %arg1: i32) -> (i32, i32) {
    %c0_i32 = arith.constant 0 : i32
    %c0_i32_0 = arith.constant 0 : i32
    %c0_i32_1 = arith.constant 0 : i32
    return %c0_i32, %c0_i32_0 : i32, i32
  }
  func.func @transform_3(%arg0: i32, %arg1: i32) -> (i32, i32) {
    %c0_i32 = arith.constant 0 : i32
    %c0_i32_0 = arith.constant 0 : i32
    %c0_i32_1 = arith.constant 0 : i32
    return %c0_i32, %c0_i32_0 : i32, i32
  }
  func.func @transform_4(%arg0: i32, %arg1: i32) -> (i32, i32) {
    %c0_i32 = arith.constant 0 : i32
    %c0_i32_0 = arith.constant 0 : i32
    %c0_i32_1 = arith.constant 0 : i32
    return %c0_i32, %c0_i32_0 : i32, i32
  }
  func.func @transform_5(%arg0: i32, %arg1: i32) -> (i32, i32) {
    %c0_i32 = arith.constant 0 : i32
    %c0_i32_0 = arith.constant 0 : i32
    %c0_i32_1 = arith.constant 0 : i32
    return %c0_i32, %c0_i32_0 : i32, i32
  }
  func.func @transform_6(%arg0: i32, %arg1: i32) -> (i32, i32, i32) {
    %c0_i32 = arith.constant 0 : i32
    %c0_i32_0 = arith.constant 0 : i32
    return %arg0, %arg1, %c0_i32 : i32, i32, i32
  }
}

</mosaic_0001>

<bundles_post_ra>
// kernel: tpu_custom_call.1
= control target key start
LH: loop header
LB: loop body
LE: loop exit
PB: predicated region body
PF: predicated region fallthrough
CT: control target
= control target key end

     0   :  { %s1666_s0 = inlined_call_operand.hbm [shape: f32[2,128], index: 0, kind: input, shape index: {}]   ;;  %s1667_s1 = inlined_call_operand.hbm [shape: f32[2,64,128], index: 1, kind: input, shape index: {}]   ;;  %s1668_s2 = inlined_call_operand.hbm [shape: bf16[128,256], index: 2, kind: input, shape index: {}]   ;;  %s1669_s3 = inlined_call_operand.vmem [shape: f32[1,256], index: 3, kind: input, shape index: {}]   ;;  %s1670_s4 = inlined_call_operand.hbm [shape: bf16[128,128], index: 4, kind: input, shape index: {}]   ;;  %s1671_s5 = inlined_call_operand.vmem [shape: f32[1,128], index: 5, kind: input, shape index: {}]   ;;  %s1672_s6 = inlined_call_operand.hbm [shape: f32[2,64,128], index: 6, kind: output, shape index: {}]  }
   0x1   :  { %1686 = sst [smem:[#allocation21_spill]] %s1669_s3 }
   0x2   :  { %1687 = sst [smem:[#allocation22_spill]] %s1671_s5 }
   0x3   :  { %1688 = sst [smem:[#allocation23_spill]] %s1672_s6 }
   0x4   :  { %11 = vsyncpa [#allocation3], 0 }
   0x5   :  { %12 = vsyncpa [#allocation6], 0 }
   0x6   :  { %14 = vsyncpa [#allocation6 + $0x1], 0 }
   0x7   :  { %15 = vsyncpa [#allocation9], 0 }
   0x8   :  { %16 = vsyncpa [#allocation4], 0 }
   0x9   :  { %18 = vsyncpa [#allocation4 + $0x1], 0  ;;  %s1334_s21 = smov 0   ;;  %s1336_s22 = smov 0  }
   0xa   :  { %s1338_s23 = smov 0   ;;  %s1340_s24 = smov 0  }
   0xb   :  { %s1342_s25 = smov 0   ;;  %s1344_s26 = smov 0  }
   0xc   :  { %s1346_s27 = smov 0   ;;  %s1348_s28 = smov 0  }
   0xd LB: > { %1689 = sst [smem:[#allocation16_spill]] %s1257_s21  ;;  %s1375_s29 = sadd.s32 4294967295, %s1285_s28   ;;  %s1285_s28 = sphi %s1348_s28, %s24_s28   ;;  %s1281_s27 = sphi %s1346_s27, %s1730_s27   ;;  %s1277_s26 = sphi %s1344_s26, %s1729_s26   ;;  %s1273_s25 = sphi %s1342_s25, %s1728_s25   ;;  %s1269_s24 = sphi %s1340_s24, %s1727_s24   ;;  %s1265_s23 = sphi %s1338_s23, %s1726_s23   ;;  %s1261_s22 = sphi %s1336_s22, %s1725_s22   ;;  %s1257_s21 = sphi %s1334_s21, %s1724_s21  }
   0xe   : > { %1690 = sst [smem:[#allocation17_spill]] %s1269_s24  ;;  %s823_s30 = sadd.s32 4294967294, %s1285_s28  }
   0xf   : > { %1691 = sst [smem:[#allocation18_spill]] %s1273_s25  ;;  %p73_p0 = scmp.ne.s32.totalorder %s1265_s23, %s1261_s22 }
  0x10   : > { %p74_p1 = scmp.eq.s32.totalorder %s1285_s28, 0  ;;  %p79_p2 = scmp.ne.s32.totalorder %s1261_s22, %s1257_s21 }
  0x11   : > { %p1673_p3 = scmp.eq.s32.totalorder %s1375_s29, 0  ;;  %p189_p4 = scmp.eq.s32.totalorder %s1375_s29, 3 }
  0x12   : > { %p1386_p5 = por %p74_p1, %p73_p0  ;;  %p195_p6 = scmp.eq.s32.totalorder %s823_s30, 3 }
  0x13   : > { %p1392_p7 = por %p1673_p3, %p79_p2  ;;  %p1396_p8 = por %p189_p4, %p73_p0 }
  0x14   : > { %p1400_p9 = por %p195_p6, %p79_p2  ;;  %p824_p10 = scmp.ge.s32.totalorder %s1285_s28, 1 }
  0x15   : > { %s1693_s9 = scalar_select %p1392_p7, 1, 0 }
  0x16   : > { %s1694_s10 = scalar_select %p1396_p8, 1, 0 }
  0x17   : > { %s1696_s11 = scalar_select %p1400_p9, 1, 0 }
  0x18   : > { %1695 = sst [smem:[#allocation19_spill]] %s1694_s10  ;;  %p202_p11 = scmp.lt.s32.totalorder %s1285_s28, 5 }
  0x19   : > { %1697 = sst [smem:[#allocation20_spill]] %s1696_s11  ;;  %s1287_s13 = smov [#allocation7]  }
  0x1a   : > { %p1406_p12 = pnand %p824_p10, %p202_p11  ;;  %s225_s14 = sshll.u32 %s1287_s13, 4  ;;  %s226_s14 = int_to_ptr.vmem [resolvable:$true] %s225_s14 }
  0x1b   : > { %p938_p0 = scmp.lt.s32.totalorder %s1285_s28, 4  ;;  %s1061_s19 = scalar_lea.hbm %s1668_s2, 2048 }
  0x1c   : > { %s1698_s12 = scalar_select %p1406_p12, 1, 0 }
  0x1d   : > { %p917_p13 = pneg %p1406_p12  ;;  %p1421_p2 = pnand %p938_p0, %p1386_p5 }
  0x1e   : > { %p1062_p4 = scmp.ne.s32.totalorder %s1668_s2, %s1061_s19  ;;  %p1068_p11 = scmp.lt.u32.totalorder %s1061_s19, %s1668_s2 }
  0x1f   : > { %p1415_p1 = pnand %p917_p13, %p1673_p3 }
  0x20   : > { %s1700_s16 = scalar_select %p1421_p2, 1, 0 }
  0x21   : > { %p1433_p6 = pneg %p1415_p1 }
  0x23   : > { %p1064_p10 = pnand %p1433_p6, %p1062_p4 }
  0x25   : > { %p1065_p5 = pneg %p1064_p10 }
  0x27   : > { %p1070_p13 = pnand %p1068_p11, %p1065_p5 }
  0x29   : > { %1073 = shalt.err (!%p1070_p13)
}
  0x2a   : > { %s1074_s17 = scalar_lea.vmem %s226_s14, 2048  ;;  %p1082_p8 = scmp.lt.s32.totalorder %s226_s14, %s226_s14 }
  0x2b   : > { %p1075_p0 = scmp.ne.s32.totalorder %s226_s14, %s1074_s17  ;;  %p1083_p7 = scmp.lt.s32.totalorder %s1074_s17, %s1074_s17 }
  0x2d   : > { %p1077_p3 = pnand %p1075_p0, %p1433_p6  ;;  %p1084_p12 = por %p1083_p7, %p1082_p8 }
  0x2f   : > { %p1078_p9 = pneg %p1077_p3 }
  0x31   : > { %p1085_p2 = pnand %p1084_p12, %p1078_p9 }
  0x33   : > { %1088 = shalt.err (!%p1085_p2)
}
  0x34   : > { %s1684_s18 = smov 128   ;;  %s1685_s20 = smov 8  }
  0x35   : > { %923 = dma.hbm_to_vmem [thread:$0]  (!%p1415_p1), %s1668_s2, 2048, %s226_s14, [#allocation6], %s1684_s18, %s1684_s18, %s1685_s20  }
  0x36   : > { %s1290_s30 = smov [#allocation2]   ;;  %s1291_s11 = smov [#allocation8]  }
  0x37   : > { %s215_s8 = sshll.u32 %s1290_s30, 4  ;;  %s241_s17 = sshll.u32 %s1291_s11, 4  ;;  %s216_s8 = int_to_ptr.vmem [resolvable:$true] %s215_s8  ;;  %s242_s17 = int_to_ptr.vmem [resolvable:$true] %s241_s17 }
  0x38   : > { %s1089_s10 = scalar_lea.hbm %s1666_s0, 32 }
  0x39   : > { %p1090_p3 = scmp.ne.s32.totalorder %s1666_s0, %s1089_s10  ;;  %p1096_p9 = scmp.lt.u32.totalorder %s1089_s10, %s1666_s0 }
  0x3b   : > { %p1092_p7 = pnand %p1090_p3, %p1433_p6 }
  0x3d   : > { %p1093_p8 = pneg %p1092_p7 }
  0x3f   : > { %p1098_p12 = pnand %p1096_p9, %p1093_p8 }
  0x41   : > { %1101 = shalt.err (!%p1098_p12)
}
  0x42   : > { %s1102_s14 = scalar_lea.vmem %s216_s8, 32  ;;  %p1110_p5 = scmp.lt.s32.totalorder %s216_s8, %s216_s8 }
  0x43   : > { %p1103_p2 = scmp.ne.s32.totalorder %s216_s8, %s1102_s14  ;;  %p1111_p11 = scmp.lt.s32.totalorder %s1102_s14, %s1102_s14 }
  0x45   : > { %p1105_p4 = pnand %p1103_p2, %p1433_p6  ;;  %p1112_p13 = por %p1111_p11, %p1110_p5 }
  0x47   : > { %p1106_p10 = pneg %p1105_p4 }
  0x49   : > { %p1113_p0 = pnand %p1112_p13, %p1106_p10 }
  0x4b   : > { %1116 = shalt.err (!%p1113_p0)
}
  0x4c   : > { %920 = dma.hbm_to_vmem [thread:$0]  (!%p1415_p1), %s1666_s0, 32, %s216_s8, [#allocation3]  }
  0x4d   : > { %s1117_s24 = scalar_lea.hbm %s1670_s4, 1024 }
  0x4e   : > { %p1118_p3 = scmp.ne.s32.totalorder %s1670_s4, %s1117_s24  ;;  %p1124_p9 = scmp.lt.u32.totalorder %s1117_s24, %s1670_s4 }
  0x50   : > { %p1120_p7 = pnand %p1118_p3, %p1433_p6 }
  0x52   : > { %p1121_p8 = pneg %p1120_p7 }
  0x54   : > { %p1126_p12 = pnand %p1124_p9, %p1121_p8 }
  0x56   : > { %1129 = shalt.err (!%p1126_p12)
}
  0x57   : > { %s1130_s19 = scalar_lea.vmem %s242_s17, 1024  ;;  %p1138_p5 = scmp.lt.s32.totalorder %s242_s17, %s242_s17 }
  0x58   : > { %p1131_p2 = scmp.ne.s32.totalorder %s242_s17, %s1130_s19  ;;  %p1139_p11 = scmp.lt.s32.totalorder %s1130_s19, %s1130_s19 }
  0x5a   : > { %p1133_p4 = pnand %p1131_p2, %p1433_p6  ;;  %p1140_p13 = por %p1139_p11, %p1138_p5 }
  0x5c   : > { %p1134_p10 = pneg %p1133_p4 }
  0x5e   : > { %p1141_p0 = pnand %p1140_p13, %p1134_p10 }
  0x60   : > { %1144 = shalt.err (!%p1141_p0)
}
  0x61   : > { %s1292_s30 = smov 64   ;;  %s1293_s8 = smov 4  }
  0x62   : > { %926 = dma.hbm_to_vmem [thread:$0]  (!%p1415_p1), %s1670_s4, 1024, %s242_s17, [#allocation9], %s1292_s30, %s1292_s30, %s1293_s8  }
  0x63   : > { %s33_s5 = sadd.s32 1, %s1277_s26  ;;  %s36_s6 = sadd.s32 1, %s1281_s27 }
  0x64   : > { %p34_p6 = scmp.ge.s32.totalorder %s33_s5, 2  ;;  %s258_s3 = sand.u32 1, %s1285_s28  }
  0x65   : > { %s260_s21 = sand.u32 1, %s1265_s23   ;;  %s830_s15 = sshll.u32 %s1277_s26, 2 }
  0x66   : > { %s1732_s5 = smov (%p34_p6, %s33_s5), 0  ;;  %s1734_s6 = smov (!%p34_p6, %s36_s6), %s1281_s27 }
  0x67   : > { %s62_s24 = ssub.s32 %s1277_s26, %s1732_s5  ;;  %p38_p3 = scmp.ge.s32.totalorder %s1734_s6, 2 }
  0x68   : > { %s829_s25 = sshll.u32 %s260_s21, 5  ;;  %s831_s17 = sshll.u32 %s1281_s27, 3 }
  0x69   : > { %s1736_s6 = smov (%p38_p3, %s1734_s6), 0  ;;  %s262_s10 = scalar_lea.vmem [#allocation5], %s829_s25 }
  0x6a   : > { %s271_s11 = sshll.u32 %s262_s10, 4  ;;  %s61_s7 = ssub.s32 %s1281_s27, %s1736_s6  ;;  %s1508_s11 = int_to_ptr.vmem [resolvable:$true] %s271_s11 }
  0x6b   : > { %s268_s19 = sadd.s32 %s831_s17, %s830_s15  ;;  %s63_s30 = sor.u32 %s62_s24, %s61_s7 }
  0x6c   : > { %s832_s8 = sshll.u32 %s268_s19, 7  ;;  %p64_p1 = scmp.eq.s32.totalorder %s63_s30, 0 }
  0x6d   : > { %s1506_s18 = scalar_lea.hbm %s1667_s1, %s832_s8  ;;  %s1702_s21 = sadd.s32 1, %s1265_s23 }
  0x6e   : > { %s1513_s20 = scalar_select %p64_p1, %s1265_s23, %s1702_s21  }
  0x6f   : > { %s1515_s25 = scalar_lea.sflag [#allocation6], %s258_s3  ;;  %s1145_s15 = scalar_lea.hbm %s1506_s18, 512 }
  0x70   : > { %p1146_p7 = scmp.ne.s32.totalorder %s1506_s18, %s1145_s15  ;;  %p1703_p8 = scmp.ne.s32.totalorder %s1700_s16, 0 }
  0x71   : > { %s1150_s10 = scalar_lea.hbm %s1667_s1, 2048  ;;  %p1151_p4 = scmp.lt.u32.totalorder %s1506_s18, %s1667_s1 }
  0x72   : > { %p1147_p9 = pneg %p1703_p8  ;;  %p1152_p10 = scmp.lt.u32.totalorder %s1150_s10, %s1145_s15 }
  0x73   : > { %p1154_p11 = scmp.lt.u32.totalorder %s1145_s15, %s1506_s18 }
  0x74   : > { %p1148_p12 = pnand %p1147_p9, %p1146_p7  ;;  %p1153_p5 = por %p1152_p10, %p1151_p4 }
  0x76   : > { %p1149_p2 = pneg %p1148_p12  ;;  %p1155_p13 = por %p1154_p11, %p1153_p5 }
  0x78   : > { %p1156_p0 = pnand %p1155_p13, %p1149_p2 }
  0x7a   : > { %1159 = shalt.err (!%p1156_p0)
}
  0x7b   : > { %s1160_s3 = scalar_lea.vmem %s1508_s11, 512  ;;  %s1294_s30 = smov [#allocation5]  }
  0x7c   : > { %p1161_p6 = scmp.ne.s32.totalorder %s1508_s11, %s1160_s3  ;;  %s1165_s8 = sshll.u32 %s1294_s30, 4  ;;  %s1166_s8 = int_to_ptr.vmem [resolvable:$false] %s1165_s8 }
  0x7d   : > { %s1167_s13 = scalar_lea.vmem %s1166_s8, 1024  ;;  %p1168_p7 = scmp.lt.s32.totalorder %s1508_s11, %s1166_s8 }
  0x7e   : > { %p1163_p3 = pnand %p1161_p6, %p1147_p9  ;;  %p1169_p12 = scmp.lt.s32.totalorder %s1167_s13, %s1160_s3 }
  0x80   : > { %p1164_p1 = pneg %p1163_p3  ;;  %p1170_p4 = por %p1169_p12, %p1168_p7 }
  0x82   : > { %p1171_p10 = pnand %p1170_p4, %p1164_p1 }
  0x84   : > { %1174 = shalt.err (!%p1171_p10)
}
  0x85   : > { %s1704_s14 = smov 8   ;;  %s1705_s21 = smov 128  }
  0x86   : > { %930 = dma.hbm_to_vmem [thread:$0]  (!%p1703_p8), %s1506_s18, 512, %s1508_s11, %s1515_s25, %s1705_s21, %s1705_s21, %s1704_s14  }
  0x87   : > { %p1706_p9 = scmp.ne.s32.totalorder %s1698_s12, 0 }
  0x88   : > { %p1707_p2 = scmp.eq.s32.totalorder (!%p1706_p9), %s1375_s29, 0 }
  0x89   : > { %283 = sbr.rel (%p1706_p9) target bundleno = 710 (0x2c6), region = 44 }
  0x90   : > { %1236 = dma.done.wait (%p1707_p2), [#allocation3], 32   ;;  %p1708_p5 = pmov %p1707_p2 }
  0x91   : > { %s289_s16 = sand.u32 1, %s1375_s29   ;;  %s291_s15 = sand.u32 1, %s1261_s22  }
  0x92   : > { %1238 = vsyncadd (%p1708_p5), [#allocation3], 4294967264  ;;  %s1556_s24 = sshll.u32 %s291_s15, 5  ;;  %s290_s18 = scalar_lea.sflag [#allocation6], %s289_s16 }
  0x93   : > { %s293_s11 = scalar_lea.vmem [#allocation5], %s1556_s24  ;;  %p1709_p8 = scmp.ne.s32.totalorder %s1693_s9, 0 }
  0x95   : > { %1240 = dma.done.wait (%p1709_p8), %s290_s18, 512  }
  0x96   : > { %1242 = vsyncadd (%p1709_p8), %s290_s18, 4294966784  ;;  %p1710_p11 = pmov %p1707_p2 }
  0x97   : > { %p1711_p13 = pmov %p1707_p2 }
  0x98   : > { %1244 = dma.done.wait (%p1710_p11), [#allocation6], 2048  }
  0x99   : > { %1246 = vsyncadd (%p1711_p13), [#allocation6], 4294965248  ;;  %p1712_p0 = pmov %p1707_p2 }
  0x9b   : > { %1248 = dma.done.wait (%p1712_p0), [#allocation9], 1024   ;;  %p1713_p6 = pmov %p1712_p0 }
  0x9c   : > { %v1295_v0 = vmov 0   ;;  %v492_v1 = vld [vmem:[%s293_s11] sm:$0xff]  ;;  %v494_v2 = vld [vmem:[%s293_s11 + $0x10] sm:$0xff]  ;;  %v1571_v3 = vld [vmem:[%s293_s11 + $0x8] sm:$0xff]  ;;  %s1714_s9 = sld [smem:[#allocation18_spill]]  ;;  %v441_v56 = vlaneseq  ;;  %s1715_s17 = sld [smem:[#allocation21_spill]] }
  0x9d   : > { %1250 = vsyncadd (%p1713_p6), [#allocation9], 4294966272  ;;  %483 = vmatprep.mubr.bf16.mxu0 %v1295_v0  ;;  %496 = vadd.xlane.f32.xlu0 %v492_v1  ;;  %v495_v4 = vld [vmem:[%s293_s11 + $0x18] sm:$0xff]  ;;  %v1017_v5 = vld [vmem:[#allocation7 + $0x4] ss:$8 sps:$4 sm:$0xff]   ;;  %s1716_s10 = sld [smem:[#allocation17_spill]] }
  0x9e   : > { %500 = vadd.xlane.f32.xlu1 %v494_v2  ;;  %v1019_v6 = vld [vmem:[#allocation7] ss:$8 sps:$4 sm:$0xff]   ;;  %v1020_v7 = vld [vmem:[#allocation7 + $0x14] ss:$8 sps:$4 sm:$0xff]   ;;  %451 = vmatprep.subr.bf16.mxu0 %v1017_v5  ;;  %v1022_v8 = vld [vmem:[#allocation7 + $0x10] ss:$8 sps:$4 sm:$0xff]  }
  0x9f   : > { %452 = vmatpush1.bf16.msra.mxu0 %v1019_v6  ;;  %v1023_v9 = vld [vmem:[#allocation7 + $0x24] ss:$8 sps:$4 sm:$0xff]   ;;  %v1025_v10 = vld [vmem:[#allocation7 + $0x20] ss:$8 sps:$4 sm:$0xff]   ;;  %v1026_v11 = vld [vmem:[#allocation7 + $0x34] ss:$8 sps:$4 sm:$0xff]  }
  0xa0   : > { %453 = vmatprep.subr.bf16.mxu0 %v1020_v7  ;;  %v1028_v12 = vld [vmem:[#allocation7 + $0x30] ss:$8 sps:$4 sm:$0xff]   ;;  %v1029_v14 = vld [vmem:[#allocation7 + $0x44] ss:$8 sps:$4 sm:$0xff]   ;;  %v1031_v16 = vld [vmem:[#allocation7 + $0x40] ss:$8 sps:$4 sm:$0xff]  }
  0xa1   : > { %498 = vadd.xlane.f32.xlu0 %v1571_v3  ;;  %v1032_v17 = vld [vmem:[#allocation7 + $0x54] ss:$8 sps:$4 sm:$0xff]   ;;  %v1034_v18 = vld [vmem:[#allocation7 + $0x50] ss:$8 sps:$4 sm:$0xff]   ;;  %v1035_v19 = vld [vmem:[#allocation7 + $0x64] ss:$8 sps:$4 sm:$0xff]  }
  0xa2   : > { %502 = vadd.xlane.f32.xlu1 %v495_v4  ;;  %s333_s29 = scalar_lea.vmem [#allocation2], %s1714_s9  ;;  %v1037_v21 = vld [vmem:[#allocation7 + $0x60] ss:$8 sps:$4 sm:$0xff]   ;;  %v1038_v23 = vld [vmem:[#allocation7 + $0x74] ss:$8 sps:$4 sm:$0xff]   ;;  %v442_v57 = vshrl.u32 %v441_v56, 7 }
  0xa3   : > { %454 = vmatpush1.bf16.msra.mxu0 %v1022_v8  ;;  %v334_v13 = vld [vmem:[%s333_s29] sm:$0x1]  ;;  %v1041_v24 = vld [vmem:[#allocation8] sm:$0xff]   ;;  %v1040_v25 = vld [vmem:[#allocation7 + $0x70] ss:$8 sps:$4 sm:$0xff]   ;;  %s866_s7 = sshll.u32 %s1716_s10, 2 }
  0xa4   : > { %455 = vmatprep.subr.bf16.mxu0 %v1023_v9  ;;  %v839_v15 = vmul.f32 -1.442695, %v334_v13  ;;  %881 = vmatprep.subr.bf16.mxu1 %v1041_v24  ;;  %v1042_v45 = vld [vmem:[#allocation8 + $0x8] sm:$0xff]   ;;  %v1043_v46 = vld [vmem:[#allocation8 + $0x10] sm:$0xff]   ;;  %v1044_v47 = vld [vmem:[#allocation8 + $0x18] sm:$0xff]   ;;  %v447_v58 = vsub.s32 1, %v442_v57 }
  0xa5   : > { %882 = vmatpush3.bf16.msra.mxu1 %v1041_v24  ;;  %v1045_v48 = vld [vmem:[#allocation8 + $0x20] sm:$0xff]   ;;  %v1046_v49 = vld [vmem:[#allocation8 + $0x28] sm:$0xff]   ;;  %v1047_v50 = vld [vmem:[#allocation8 + $0x30] sm:$0xff]   ;;  %s867_s19 = sshll.u32 %s1714_s9, 3  ;;  %s1717_s8 = sld [smem:[#allocation22_spill]] }
  0xa6   : > { %1049 = vpow2.f32 %v839_v15  ;;  %883 = vmatprep.subr.bf16.mxu1 %v1042_v45  ;;  %v1048_v51 = vld [vmem:[#allocation8 + $0x38] sm:$0xff]   ;;  %s697_s13 = sadd.s32 %s867_s19, %s866_s7  ;;  %s329_s14 = scalar_lea.vmem [#allocation10], %s1556_s24 }
  0xa7   : > { %456 = vmatpush1.bf16.msra.mxu0 %v1025_v10  ;;  %v359_v59 = vld [vmem:[%s1715_s17] sm:$0x3]  ;;  %s700_s21 = sshll.u32 %s329_s14, 4  ;;  %s1718_s16 = sld [smem:[#allocation19_spill]]  ;;  %s1605_s21 = int_to_ptr.vmem [resolvable:$true] %s700_s21 }
  0xa8   : > { %457 = vmatprep.subr.bf16.mxu0 %v1026_v11  ;;  %v448_v62 = vrot.slane %v359_v59, %v447_v58  ;;  %s868_s18 = sshll.u32 %s697_s13, 7  ;;  %s1719_s9 = sld [smem:[#allocation23_spill]] }
  0xa9   : > { %884 = vmatpush3.bf16.msra.mxu1 %v1042_v45  ;;  %s1614_s12 = scalar_lea.sflag [#allocation4], %s291_s15  ;;  %s1175_s25 = scalar_lea.vmem %s1605_s21, 512 }
  0xaa   : > { %885 = vmatprep.subr.bf16.mxu1 %v1043_v46  ;;  %p1176_p3 = scmp.ne.s32.totalorder %s1605_s21, %s1175_s25  ;;  %s1296_s17 = smov [#allocation10]  }
  0xab   : > { %458 = vmatpush1.bf16.msra.mxu0 %v1028_v12  ;;  %s1179_s10 = sshll.u32 %s1296_s17, 4  ;;  %s1180_s10 = int_to_ptr.vmem [resolvable:$false] %s1179_s10 }
  0xac   : > { %459 = vmatprep.subr.bf16.mxu0 %v1029_v14  ;;  %s1181_s7 = scalar_lea.vmem %s1180_s10, 1024  ;;  %p1182_p4 = scmp.lt.s32.totalorder %s1605_s21, %s1180_s10 }
  0xad   : > { %886 = vmatpush3.bf16.msra.mxu1 %v1043_v46  ;;  %p1720_p1 = scmp.ne.s32.totalorder %s1718_s16, 0  ;;  %p1183_p10 = scmp.lt.s32.totalorder %s1181_s7, %s1175_s25 }
  0xae   : > { %887 = vmatprep.subr.bf16.mxu1 %v1044_v47  ;;  %s1610_s29 = scalar_lea.hbm %s1719_s9, %s868_s18 }
  0xaf   : > { %460 = vmatpush1.bf16.msra.mxu0 %v1031_v16  ;;  %p1177_p7 = pnand %p1176_p3, %p1720_p1  ;;  %p1184_p9 = por %p1183_p10, %p1182_p4 }
  0xb0   : > { %461 = vmatprep.subr.bf16.mxu0 %v1032_v17  ;;  %v1050_v20 = vpop.eup %1049 }
  0xb1   : > { %v338_v22 = vadd.f32 1.0, %v1050_v20  ;;  %888 = vmatpush3.bf16.msra.mxu1 %v1044_v47  ;;  %p1178_p12 = pneg %p1177_p7 }
  0xb2   : > { %889 = vmatprep.subr.bf16.mxu1 %v1045_v48 }
  0xb3   : > { %462 = vmatpush1.bf16.msra.mxu0 %v1034_v18  ;;  %1051 = vrcp.f32 %v338_v22  ;;  %p1185_p2 = pnand %p1184_p9, %p1178_p12 }
  0xb4   : > { %463 = vmatprep.subr.bf16.mxu0 %v1035_v19 }
  0xb5   : > { %890 = vmatpush3.bf16.msra.mxu1 %v1045_v48 }
  0xb6   : > { %891 = vmatprep.subr.bf16.mxu1 %v1046_v49 }
  0xb7   : > { %464 = vmatpush1.bf16.msra.mxu0 %v1037_v21 }
  0xb8   : > { %465 = vmatprep.subr.bf16.mxu0 %v1038_v23 }
  0xb9   : > { %892 = vmatpush3.bf16.msra.mxu1 %v1046_v49 }
  0xba   : > { %893 = vmatprep.subr.bf16.mxu1 %v1047_v50 }
  0xbb   : > { %466 = vmatpush1.bf16.msra.mxu0 %v1040_v25 }
  0xbd   : > { %v1052_v26 = vpop.eup %1051  ;;  %894 = vmatpush3.bf16.msra.mxu1 %v1047_v50 }
  0xbe   : > { %v341_v27 = vmul.f32 %v1052_v26, %v334_v13  ;;  %895 = vmatprep.subr.bf16.mxu1 %v1048_v51 }
  0xc0   : > { %v342_v28 = vpack.c.bf16 %v341_v27, %v341_v27 }
  0xc1   : > { %896 = vmatpush3.bf16.msra.mxu1 %v1048_v51 }
  0xc2   : > { %484 = vmatmul.mubr.bf16.vlgmr.msra.gmra.mrb[0].mxu0 %v342_v28 }
 0x12a   : > { %v497_v29 = vpop.xlane.xlu0 %496 }
 0x12b   : > { %v501_v30 = vpop.xlane.xlu1 %500  ;;  %v505_v31 = vmul.f32 0.0078125, %v497_v29 }
 0x12c   : > { %v507_v32 = vmul.f32 0.0078125, %v501_v30 }
 0x12d   : > { %v1575_v33 = vsub.f32 %v492_v1, %v505_v31 }
 0x12e   : > { %v1577_v34 = vsub.f32 %v494_v2, %v507_v32  ;;  %v499_v35 = vpop.xlane.xlu0 %498  ;;  %v443_v2 = vsub.s32 0, %v442_v57 }
 0x12f   : > { %v503_v36 = vpop.xlane.xlu1 %502  ;;  %v506_v37 = vmul.f32 0.0078125, %v499_v35  ;;  %v513_v38 = vmul.f32 %v1575_v33, %v1575_v33 }
 0x130   : > { %v508_v39 = vmul.f32 0.0078125, %v503_v36  ;;  %v515_v42 = vmul.f32 %v1577_v34, %v1577_v34  ;;  %v444_v9 = vrot.slane %v359_v59, %v443_v2 }
 0x131   : > { %v1582_v40 = vsub.f32 %v1571_v3, %v506_v37  ;;  %517 = vadd.xlane.f32.xlu0 %v513_v38 }
 0x132   : > { %v1584_v41 = vsub.f32 %v495_v4, %v508_v39 }
 0x133   : > { %v514_v43 = vmul.f32 %v1582_v40, %v1582_v40 }
 0x134   : > { %v516_v44 = vmul.f32 %v1584_v41, %v1584_v41 }
 0x135   : > { %521 = vadd.xlane.f32.xlu0 %v515_v42  ;;  %519 = vadd.xlane.f32.xlu1 %v514_v43 }
 0x139   : > { %523 = vadd.xlane.f32.xlu1 %v516_v44 }
 0x195   : > { %v485_v52 = vpop.f32.mrb[0].mxu0 }
 0x196   : > { %v487_v53 = vpop.f32.mrb[1].mxu0  ;;  %v486_v13 = vadd.f32 %v485_v52, %v444_v9 }
 0x197   : > { %v489_v54 = vpop.f32.mrb[2].mxu0  ;;  %v488_v5 = vadd.f32 %v487_v53, %v448_v62 }
 0x198   : > { %v490_v55 = vpop.f32.mrb[3].mxu0  ;;  %v553_v16 = vrot.slane %v486_v13, %v443_v2 }
 0x199   : > { %v541_v11 = vadd.f32 1.0, %v488_v5 }
 0x19b   : > { %v545_v14 = vrot.slane %v541_v11, %v443_v2 }
 0x1be   : > { %v518_v60 = vpop.xlane.xlu0 %517 }
 0x1bf   : > { %v525_v61 = vmul.f32 0.0078125, %v518_v60 }
 0x1c1   : > { %v529_v63 = vadd.f32 1e-06, %v525_v61 }
 0x1c2   : > { %v520_v0 = vpop.xlane.xlu1 %519  ;;  %v522_v1 = vpop.xlane.xlu0 %521 }
 0x1c3   : > { %1053 = vrsqrt.f32 %v529_v63  ;;  %v526_v3 = vmul.f32 0.0078125, %v520_v0  ;;  %v527_v4 = vmul.f32 0.0078125, %v522_v1 }
 0x1c5   : > { %v530_v6 = vadd.f32 1e-06, %v526_v3  ;;  %v531_v7 = vadd.f32 1e-06, %v527_v4 }
 0x1c6   : > { %v524_v8 = vpop.xlane.xlu1 %523 }
 0x1c7   : > { %1055 = vrsqrt.f32 %v530_v6  ;;  %v528_v10 = vmul.f32 0.0078125, %v524_v8 }
 0x1c8   : > { %1057 = vrsqrt.f32 %v531_v7 }
 0x1c9   : > { %v532_v12 = vadd.f32 1e-06, %v528_v10 }
 0x1cb   : > { %1059 = vrsqrt.f32 %v532_v12 }
 0x1cd   : > { %v1054_v15 = vpop.eup %1053 }
 0x1ce   : > { %v537_v17 = vmul.f32 %v1054_v15, %v1575_v33 }
 0x1d0   : > { %v546_v18 = vmul.f32 %v545_v14, %v537_v17 }
 0x1d1   : > { %v1056_v19 = vpop.eup %1055 }
 0x1d2   : > { %v1058_v20 = vpop.eup %1057  ;;  %v538_v21 = vmul.f32 %v1056_v19, %v1582_v40  ;;  %v554_v22 = vadd.f32 %v553_v16, %v546_v18 }
 0x1d3   : > { %v539_v23 = vmul.f32 %v1058_v20, %v1577_v34  ;;  %v856_v34 = vld [vmem:[%s1717_s8] ss:$0 sm:$0xff] }
 0x1d4   : > { %v547_v24 = vmul.f32 %v545_v14, %v538_v21 }
 0x1d5   : > { %v1060_v25 = vpop.eup %1059  ;;  %v548_v26 = vmul.f32 %v545_v14, %v539_v23 }
 0x1d6   : > { %v555_v27 = vadd.f32 %v553_v16, %v547_v24  ;;  %v540_v28 = vmul.f32 %v1060_v25, %v1584_v41 }
 0x1d7   : > { %v556_v29 = vadd.f32 %v553_v16, %v548_v26 }
 0x1d8   : > { %v558_v30 = vpack.c.bf16 %v555_v27, %v554_v22  ;;  %v549_v31 = vmul.f32 %v545_v14, %v540_v28 }
 0x1da   : > { %897 = vmatprep.mubr.bf16.mxu1 %v558_v30  ;;  %v557_v32 = vadd.f32 %v553_v16, %v549_v31 }
 0x1dc   : > { %v559_v33 = vpack.c.bf16 %v557_v32, %v556_v29 }
 0x1de   : > { %898 = vmatmul.mubr.bf16.vlgmr.msra.gmra.mrb[0].mxu1 %v559_v33 }
 0x2b1   : > { %v899_v35 = vpop.f32.mrb[0].mxu1 }
 0x2b2   : > { %v674_v36 = vadd.f32 %v899_v35, %v856_v34  ;;  %v665_v37 = vpop.f32.mrb[1].mxu1 }
 0x2b3   : > { %v666_v38 = vadd.f32 %v856_v34, %v665_v37  ;;  %v900_v39 = vpop.f32.mrb[2].mxu1 }
 0x2b4   : > { %682 = vst [vmem:[%s329_s14 + $0x10] sm:$0xff] %v674_v36  ;;  %v677_v40 = vadd.f32 %v900_v39, %v856_v34  ;;  %v668_v41 = vpop.f32.mrb[3].mxu1 }
 0x2b5   : > { %680 = vst [vmem:[%s329_s14] sm:$0xff] %v666_v38  ;;  %v669_v42 = vadd.f32 %v856_v34, %v668_v41 }
 0x2b6   : > { %683 = vst [vmem:[%s329_s14 + $0x18] sm:$0xff] %v677_v40 }
 0x2b7   : > { %681 = vst [vmem:[%s329_s14 + $0x8] sm:$0xff] %v669_v42 }
 0x2b8   : > { %1188 = shalt.err (!%p1185_p2)
}
 0x2b9   : > { %s1189_s15 = scalar_lea.hbm %s1610_s29, 512  ;;  %s1193_s30 = scalar_lea.hbm %s1719_s9, 2048 }
 0x2ba   : > { %p1190_p5 = scmp.ne.s32.totalorder %s1610_s29, %s1189_s15  ;;  %p1194_p13 = scmp.lt.u32.totalorder %s1610_s29, %s1719_s9 }
 0x2bb   : > { %p1195_p0 = scmp.lt.u32.totalorder %s1193_s30, %s1189_s15  ;;  %p1197_p3 = scmp.lt.u32.totalorder %s1189_s15, %s1610_s29 }
 0x2bc   : > { %p1191_p8 = pnand %p1190_p5, %p1720_p1 }
 0x2bd   : > { %p1196_p6 = por %p1195_p0, %p1194_p13 }
 0x2be   : > { %p1192_p11 = pneg %p1191_p8 }
 0x2bf   : > { %p1198_p7 = por %p1197_p3, %p1196_p6 }
 0x2c1   : > { %p1199_p12 = pnand %p1198_p7, %p1192_p11 }
 0x2c3   : > { %1202 = shalt.err (!%p1199_p12)
}
 0x2c4   : > { %s1297_s14 = smov 128   ;;  %s1298_s18 = smov 8  }
 0x2c5   : > { %915 = dma.vmem_to_hbm [thread:$0]  (%p1720_p1), %s1605_s21, 512, %s1610_s29, %s1614_s12, %s1297_s14, %s1297_s14, %s1298_s18  }
 0x2c6 PF: > { %s1721_s24 = sld [smem:[#allocation16_spill]]  ;;  %s1722_s11 = sld [smem:[#allocation20_spill]] }
 0x2c7   : > { %p942_p4 = scmp.ge.s32.totalorder %s1285_s28, 2 }
 0x2cc   : > { %s715_s25 = sand.u32 1, %s1721_s24   ;;  %p1723_p10 = scmp.ne.s32.totalorder %s1722_s11, 0 }
 0x2cd   : > { %s716_s17 = scalar_lea.sflag [#allocation4], %s715_s25 }
 0x2ce   : > { %p932_p9 = pnand %p942_p4, %p1723_p10 }
 0x2d0   : > { %1252 = dma.done.wait (!%p932_p9), %s716_s17, 512  }
 0x2d1   : > { %1254 = vsyncadd (!%p932_p9), %s716_s17, 4294966784  ;;  %s24_s28 = sadd.s32 1, %s1285_s28   ;;  %s1724_s21 = smov %s1261_s22 }
 0x2d2   : > { %p21_p2 = scmp.ge.s32.totalorder %s24_s28, 6   ;;  %s1725_s22 = smov %s1265_s23 }
 0x2d3   : > { %s1726_s23 = smov %s1513_s20  ;;  %s1727_s24 = smov %s1277_s26 }
 0x2d4   : > { %s1728_s25 = smov %s1281_s27  ;;  %s1729_s26 = smov %s1732_s5 }
 0x2d5   : > { %s1730_s27 = smov %s1736_s6  ;;  %23 = sbr.rel (!%p21_p2) target bundleno = 13 (0xd), region = 103 }
 0x2dc   :  { %721 = vsyncpa [#allocation3], 1 }
 0x2dd   :  { %723 = vsyncpa [#allocation3 + $0x1], 1 }
 0x2de   :  { %724 = vsyncpa [#allocation6], 1 }
 0x2df   :  { %726 = vsyncpa [#allocation6 + $0x1], 1 }
 0x2e0   :  { %727 = vsyncpa [#allocation9], 1 }
 0x2e1   :  { %728 = vsyncpa [#allocation4], 1 }
 0x2e2   :  { %730 = vsyncpa [#allocation4 + $0x1], 1 }

</bundles_post_ra>
